<compile_context>
chip_gen: v7x
topology: tpu7x:2x2x1
jax: 0.10.0
libtpu: 0.0.40
codegen_flags: <defaults>
</compile_context>

<pallas_src>
import functools

import jax
import jax.numpy as jnp
import numpy as np
from jax.experimental import pallas as pl
from jax.experimental.pallas import tpu as pltpu

TIME_DIM = 32
BASE_NUM = 50
LEAKY_SLOPE = 0.01  # torch.nn.LeakyReLU() default negative_slope
LANES = 128


def _round_up(x, m):
    return (x + m - 1) // m * m


def _pick_tile(total_rows, max_tile):
    """Largest multiple-of-8 tile <= max_tile that still yields >= 2 grid steps
    (v7x has 2 TensorCores) whenever total_rows allows it."""
    return max(8, min(max_tile, total_rows, _round_up(pl.cdiv(total_rows, 2), 8)))


# --------------------- non-entity-specific branch ---------------------------
def _harmonic_kernel(ts_ref, fmask_ref, phase_ref, o_ref, *, pack):
    ts = ts_ref[...]          # (tile_rows, pack)
    fmask = fmask_ref[...]    # (pack, pack*D); row p = freq in lanes [p*D,(p+1)*D)
    # Full-128-lane expansion: each term multiplies a broadcast column by a
    # masked freq row (exact f32; other lanes contribute exact zeros).
    vals = ts[:, 0:1] * fmask[0:1, :]
    for p in range(1, pack):
        vals = vals + ts[:, p:p + 1] * fmask[p:p + 1, :]
    o_ref[...] = jnp.cos(vals + phase_ref[...])   # unmasked full-width stores


def time_encode(ts, basis_freq, phase, *, max_tile_rows=1024):
    """ts: (B, L) float32 -> (harmonic (B, L, D), reg_time == 0)."""
    B, L = ts.shape
    D = basis_freq.shape[0]
    assert D <= LANES and LANES % D == 0, (
        "time_dim must divide 128 for the lane-dense packed layout")
    pack = LANES // D
    total = B * L

    rows = pl.cdiv(total, pack)
    rows8 = _round_up(rows, 8)                  # tiny sublane-alignment pad only
    tile_rows = _pick_tile(rows8, max_tile_rows)

    ts_flat = jnp.pad(ts.reshape(-1).astype(jnp.float32),
                      (0, rows8 * pack - total))
    ts2 = ts_flat.reshape(rows8, pack)
    freq = basis_freq.astype(jnp.float32).reshape(1, D)
    fmask = jnp.kron(jnp.eye(pack, dtype=jnp.float32), freq)        # (pack, 128)
    phase_t = jnp.tile(phase.astype(jnp.float32).reshape(1, D), (1, pack))

    out = pl.pallas_call(
        functools.partial(_harmonic_kernel, pack=pack),
        out_shape=jax.ShapeDtypeStruct((rows8, pack * D), jnp.float32),
        grid=(pl.cdiv(rows8, tile_rows),),
        in_specs=[
            pl.BlockSpec((tile_rows, pack), lambda r: (r, 0)),
            pl.BlockSpec((pack, pack * D), lambda r: (0, 0)),   # resident
            pl.BlockSpec((1, pack * D), lambda r: (0, 0)),      # resident
        ],
        out_specs=pl.BlockSpec((tile_rows, pack * D), lambda r: (r, 0)),
        compiler_params=pltpu.CompilerParams(dimension_semantics=("parallel",)),
    )(ts2, fmask, phase_t)

    # layout plumbing back to the torch convention (batch, seq, time_dim)
    harmonic = out.reshape(rows8 * pack, D)[:total].reshape(B, L, D)
    reg_time = 0
    return harmonic, reg_time


# ------------------------ entity-specific branch ----------------------------
def _es_kernel(g_ref, a_ref, ab_ref, seg_ref, harm_ref, reg_ref):
    # g_ref: (6, tile_r, 128).  Each 128-lane row packs `pack` logical rows of
    # P = basis_freq @ phase; groups = [P[i0], P[i1], P[i2], P[j0], P[j1], P[j2]].
    g0, g1, g2 = g_ref[0], g_ref[1], g_ref[2]
    gb0, gb1, gb2 = g_ref[3], g_ref[4], g_ref[5]

    # Fused Linear(2D->D, bias=False): cat(h, hb) @ W.T == h @ Wt[:D] + hb @ Wt[D:],
    # applied per packed 32-lane segment with resident block-diagonal weights.
    z = (jnp.dot(g0, a_ref[...], preferred_element_type=jnp.float32)
         + jnp.dot(gb0, ab_ref[...], preferred_element_type=jnp.float32))
    harm_ref[...] = jnp.where(z >= 0, z, LEAKY_SLOPE * z)       # LeakyReLU

    seg = seg_ref[...]                                          # (128, pack) 0/1

    def seg_norm(x):  # per-logical-row L2 norm via MXU segment-sum
        return jnp.sqrt(jnp.dot(x * x, seg, preferred_element_type=jnp.float32))

    reg_ref[0] = seg_norm(g1 - g0) + seg_norm(g2 - g0)          # (tile_r, pack)
    reg_ref[1] = seg_norm(gb1 - gb0) + seg_norm(gb2 - gb0)


def time_encode_entity_specific(ts_idx, ts_base_idx, basis_freq, phase, weight,
                                *, max_tile_rows=256):
    """ts_idx / ts_base_idx: int32 (3, N) timestamp indices."""
    base, D = phase.shape
    N = ts_idx.shape[1]
    assert D <= LANES and LANES % D == 0, (
        "time_dim must divide 128 for the lane-dense packed layout")
    pack = LANES // D
    f32 = jnp.float32
    hi = jax.lax.Precision.HIGHEST

    # Linearity: basis_freq[idx] @ phase == (basis_freq @ phase)[idx].
    P = jnp.dot(basis_freq.astype(f32), phase.astype(f32), precision=hi)   # (T, D)
    Wt = weight.astype(f32).T                                              # (2D, D)
    eye_p = jnp.eye(pack, dtype=f32)
    a_bd = jnp.kron(eye_p, Wt[:D])                     # (128, 128) block-diag
    ab_bd = jnp.kron(eye_p, Wt[D:])                    # (128, 128) block-diag
    seg = jnp.kron(eye_p, jnp.ones((D, 1), f32))       # (128, pack) segment sums

    Np = _round_up(max(N, 1), 8 * pack)
    Rp = Np // pack
    tile_r = _pick_tile(Rp, max_tile_rows)

    def pad_idx(ix):
        return jnp.pad(ix.astype(jnp.int32), ((0, 0), (0, Np - N)))

    ti, tb = pad_idx(ts_idx), pad_idx(ts_base_idx)
    idx6 = jnp.stack([ti[0], ti[1], ti[2], tb[0], tb[1], tb[2]], axis=0)   # (6, Np)
    # Tiny-table XLA gather of precomputed P rows, then a free lane-dense
    # packing reshape (pack logical rows -> one 128-lane row).
    g = P[idx6].reshape(6, Rp, pack * D)                                   # (6, Rp, 128)

    harm, reg = pl.pallas_call(
        _es_kernel,
        out_shape=(jax.ShapeDtypeStruct((Rp, pack * D), f32),
                   jax.ShapeDtypeStruct((2, Rp, pack), f32)),
        grid=(pl.cdiv(Rp, tile_r),),
        in_specs=[
            pl.BlockSpec((6, tile_r, pack * D), lambda r: (0, r, 0)),
            pl.BlockSpec((pack * D, pack * D), lambda r: (0, 0)),   # resident
            pl.BlockSpec((pack * D, pack * D), lambda r: (0, 0)),   # resident
            pl.BlockSpec((pack * D, pack), lambda r: (0, 0)),       # resident
        ],
        out_specs=(pl.BlockSpec((tile_r, pack * D), lambda r: (r, 0)),
                   pl.BlockSpec((2, tile_r, pack), lambda r: (0, r, 0))),
        compiler_params=pltpu.CompilerParams(dimension_semantics=("parallel",)),
    )(g, a_bd, ab_bd, seg)

    harmonic = harm.reshape(Np, D)[:N]                        # free unpack reshape
    reg_time = reg.reshape(2, Np)[:, :N].reshape(2 * N)       # [reg_time, reg_time_base]
    return harmonic, reg_time


if __name__ == "__main__":
    key = jax.random.PRNGKey(0)
    k1, k2, k3, k4, k5 = jax.random.split(key, 5)
    hi = jax.lax.Precision.HIGHEST

    # ---------- non-entity-specific (module default) ----------
    B, L, D = 2, 8, TIME_DIM
    basis_freq = (1.0 / 10.0 ** jnp.linspace(0.0, 9.0, D)).astype(jnp.float32)
    phase = jnp.zeros((D,), jnp.float32)
    ts = jax.random.uniform(k1, (B, L), jnp.float32, 0.0, 100.0)

    harmonic, reg_time = time_encode(ts, basis_freq, phase)
    harmonic = jax.block_until_ready(harmonic)
    ref = jnp.cos(ts[:, :, None] * basis_freq[None, None, :] + phase[None, None, :])
    np.testing.assert_allclose(np.asarray(harmonic), np.asarray(ref),
                               rtol=1e-5, atol=1e-5)
    assert reg_time == 0

    # ---------- entity-specific ----------
    T, N = 16, 8
    es_basis_freq = jax.random.normal(k2, (T, BASE_NUM), dtype=jnp.float32)
    # NOTE: module __init__ sets phase to zeros (trivially-zero outputs); we use
    # small deterministic random values of the same shape so the math is exercised.
    es_phase = 0.1 * jax.random.normal(k3, (BASE_NUM, D), dtype=jnp.float32)
    eye = jnp.eye(D, dtype=jnp.float32)
    weight = jnp.concatenate([eye, -eye], axis=1)   # (D, 2D), as in __init__

    ts0 = jax.random.randint(k4, (N,), 1, T - 1)
    ts_idx = jnp.stack([ts0, ts0 - 1, ts0 + 1], axis=0).astype(jnp.int32)
    tsb0 = jax.random.randint(k5, (N,), 1, T - 1)
    ts_base_idx = jnp.stack([tsb0, tsb0 - 1, tsb0 + 1], axis=0).astype(jnp.int32)

    harm_es, reg_es = time_encode_entity_specific(
        ts_idx, ts_base_idx, es_basis_freq, es_phase, weight)
    harm_es = jax.block_until_ready(harm_es)
    reg_es = jax.block_until_ready(reg_es)

    # plain-JAX reference for the entity-specific branch (matches torch forward)
    dot = functools.partial(jnp.dot, precision=hi)
    f0, f1, f2 = (es_basis_freq[ts_idx[k]] for k in range(3))
    fb0, fb1, fb2 = (es_basis_freq[ts_base_idx[k]] for k in range(3))
    h_ref = dot(f0, es_phase)
    hb_ref = dot(fb0, es_phase)
    reg_ref = (jnp.linalg.norm(dot(f1 - f0, es_phase), axis=1)
               + jnp.linalg.norm(dot(f2 - f0, es_phase), axis=1))
    regb_ref = (jnp.linalg.norm(dot(fb1 - fb0, es_phase), axis=1)
                + jnp.linalg.norm(dot(fb2 - fb0, es_phase), axis=1))
    z_ref = dot(jnp.concatenate([h_ref, hb_ref], axis=1), weight.T)
    harm_ref2 = jnp.where(z_ref >= 0, z_ref, LEAKY_SLOPE * z_ref)
    reg_all_ref = jnp.concatenate([reg_ref, regb_ref], axis=0)

    np.testing.assert_allclose(np.asarray(harm_es), np.asarray(harm_ref2),
                               rtol=1e-4, atol=1e-4)
    np.testing.assert_allclose(np.asarray(reg_es), np.asarray(reg_all_ref),
                               rtol=1e-4, atol=1e-4)

    print("KERNEL_OK")
</pallas_src>

<mosaic_0001>
module attributes {stable_mosaic.version = 11 : i64} {
  func.func @_harmonic_kernel(%arg0: i32, %arg1: memref<8x4xf32, #tpu.memory_space<vmem>>, %arg2: memref<4x128xf32, #tpu.memory_space<vmem>>, %arg3: memref<1x128xf32, #tpu.memory_space<vmem>>, %arg4: memref<8x128xf32, #tpu.memory_space<vmem>>) attributes {dimension_semantics = [#tpu.dimension_semantics<parallel>], iteration_bounds = array<i64: 1>, scalar_prefetch = 0 : i64, scratch_operands = 0 : i64, tpu.core_type = #tpu.core_type<tc>, window_params = [{transform_indices = @transform_0, window_bounds = array<i64: 8, 4>}, {pipeline_mode = #tpu.pipeline_mode<synchronous>, transform_indices = @transform_1, window_bounds = array<i64: 4, 128>}, {pipeline_mode = #tpu.pipeline_mode<synchronous>, transform_indices = @transform_2, window_bounds = array<i64: 1, 128>}, {transform_indices = @transform_3, window_bounds = array<i64: 8, 128>}]} {
    %c0 = arith.constant 0 : index
    %c0_0 = arith.constant 0 : index
    %0 = vector.load %arg1[%c0, %c0_0] : memref<8x4xf32, #tpu.memory_space<vmem>>, vector<8x4xf32>
    %c0_1 = arith.constant 0 : index
    %c0_2 = arith.constant 0 : index
    %1 = vector.load %arg2[%c0_1, %c0_2] : memref<4x128xf32, #tpu.memory_space<vmem>>, vector<4x128xf32>
    %2 = vector.extract_strided_slice %0 {offsets = [0, 0], sizes = [8, 1], strides = [1, 1]} : vector<8x4xf32> to vector<8x1xf32>
    %3 = vector.extract_strided_slice %1 {offsets = [0, 0], sizes = [1, 128], strides = [1, 1]} : vector<4x128xf32> to vector<1x128xf32>
    %4 = vector.broadcast %2 : vector<8x1xf32> to vector<8x128xf32>
    %5 = vector.broadcast %3 : vector<1x128xf32> to vector<8x128xf32>
    %6 = arith.mulf %4, %5 : vector<8x128xf32>
    %7 = vector.extract_strided_slice %0 {offsets = [0, 1], sizes = [8, 1], strides = [1, 1]} : vector<8x4xf32> to vector<8x1xf32>
    %8 = vector.extract_strided_slice %1 {offsets = [1, 0], sizes = [1, 128], strides = [1, 1]} : vector<4x128xf32> to vector<1x128xf32>
    %9 = vector.broadcast %7 : vector<8x1xf32> to vector<8x128xf32>
    %10 = vector.broadcast %8 : vector<1x128xf32> to vector<8x128xf32>
    %11 = arith.mulf %9, %10 : vector<8x128xf32>
    %12 = arith.addf %6, %11 : vector<8x128xf32>
    %13 = vector.extract_strided_slice %0 {offsets = [0, 2], sizes = [8, 1], strides = [1, 1]} : vector<8x4xf32> to vector<8x1xf32>
    %14 = vector.extract_strided_slice %1 {offsets = [2, 0], sizes = [1, 128], strides = [1, 1]} : vector<4x128xf32> to vector<1x128xf32>
    %15 = vector.broadcast %13 : vector<8x1xf32> to vector<8x128xf32>
    %16 = vector.broadcast %14 : vector<1x128xf32> to vector<8x128xf32>
    %17 = arith.mulf %15, %16 : vector<8x128xf32>
    %18 = arith.addf %12, %17 : vector<8x128xf32>
    %19 = vector.extract_strided_slice %0 {offsets = [0, 3], sizes = [8, 1], strides = [1, 1]} : vector<8x4xf32> to vector<8x1xf32>
    %20 = vector.extract_strided_slice %1 {offsets = [3, 0], sizes = [1, 128], strides = [1, 1]} : vector<4x128xf32> to vector<1x128xf32>
    %21 = vector.broadcast %19 : vector<8x1xf32> to vector<8x128xf32>
    %22 = vector.broadcast %20 : vector<1x128xf32> to vector<8x128xf32>
    %23 = arith.mulf %21, %22 : vector<8x128xf32>
    %24 = arith.addf %18, %23 : vector<8x128xf32>
    %c0_3 = arith.constant 0 : index
    %c0_4 = arith.constant 0 : index
    %25 = vector.load %arg3[%c0_3, %c0_4] : memref<1x128xf32, #tpu.memory_space<vmem>>, vector<1x128xf32>
    %26 = vector.broadcast %25 : vector<1x128xf32> to vector<8x128xf32>
    %27 = arith.addf %24, %26 : vector<8x128xf32>
    %28 = math.cos %27 : vector<8x128xf32>
    %c0_5 = arith.constant 0 : index
    %c0_6 = arith.constant 0 : index
    %29 = vector.load %arg4[%c0_5, %c0_6] : memref<8x128xf32, #tpu.memory_space<vmem>>, vector<8x128xf32>
    tpu.vector_store %arg4[%c0_5, %c0_6], %28 {strides = array<i32>} : memref<8x128xf32, #tpu.memory_space<vmem>>, vector<8x128xf32>,
    return
  }
  func.func @transform_0(%arg0: i32) -> (i32, i32) {
    %c0_i32 = arith.constant 0 : i32
    %c0_i32_0 = arith.constant 0 : i32
    return %arg0, %c0_i32 : i32, i32
  }
  func.func @transform_1(%arg0: i32) -> (i32, i32) {
    %c0_i32 = arith.constant 0 : i32
    %c0_i32_0 = arith.constant 0 : i32
    %c0_i32_1 = arith.constant 0 : i32
    return %c0_i32, %c0_i32_0 : i32, i32
  }
  func.func @transform_2(%arg0: i32) -> (i32, i32) {
    %c0_i32 = arith.constant 0 : i32
    %c0_i32_0 = arith.constant 0 : i32
    %c0_i32_1 = arith.constant 0 : i32
    return %c0_i32, %c0_i32_0 : i32, i32
  }
  func.func @transform_3(%arg0: i32) -> (i32, i32) {
    %c0_i32 = arith.constant 0 : i32
    %c0_i32_0 = arith.constant 0 : i32
    return %arg0, %c0_i32 : i32, i32
  }
}

</mosaic_0001>

<bundles_post_ra>
// kernel: tpu_custom_call.1
= control target key start
LH: loop header
LB: loop body
LE: loop exit
PB: predicated region body
PF: predicated region fallthrough
CT: control target
= control target key end

     0   :  { %v236_v1 = vmov 0   ;;  %v237_v2 = vmov 2   ;;  %s309_s0 = inlined_call_operand.vmem [shape: f32[8,4], index: 0, kind: input, shape index: {}]   ;;  %s310_s1 = inlined_call_operand.vmem [shape: f32[4,128], index: 1, kind: input, shape index: {}]   ;;  %s311_s2 = inlined_call_operand.vmem [shape: f32[1,128], index: 2, kind: input, shape index: {}]   ;;  %s312_s3 = inlined_call_operand.hbm [shape: f32[8,128], index: 3, kind: output, shape index: {}]  }
   0x1   :  { %v15_v0 = vld [vmem:[%s309_s0] sm:$0xff]  ;;  %203 = vset.pattern.permute.xlu0 %v236_v1  ;;  %205 = vset.pattern.permute.xlu1 %v237_v2 }
   0x2   :  { %8 = vsyncpa [#allocation3], 0  ;;  %19 = vperm.xlu0 %203, %v15_v0   ;;  %38 = vperm.xlu1 %205, %v15_v0   ;;  %v238_v3 = vmov 1   ;;  %v239_v4 = vmov 3   ;;  %v22_v5 = vlaneseq  ;;  %v16_v9 = vld [vmem:[%s310_s1] sm:$0xf] }
   0x3   :  { %v183_v26 = vld [vmem:[%s311_s2] ss:$0 sm:$0xff]  ;;  %v240_v39 = vmov 683565275   ;;  %v241_v41 = vmov 2475754826  }
   0x4   :  { %v23_v6 = vshrl.u32 %v22_v5, 7  ;;  %v242_v44 = vmov 2131351028   ;;  %v243_v47 = vmov 2102212464   ;;  %s246_s1 = smov [#allocation2]  }
   0x5   :  { %v244_v50 = vmov 920167782   ;;  %v245_v53 = vmov 1326507024   ;;  %s175_s2 = sshll.u32 %s246_s1, 4  ;;  %s176_s2 = int_to_ptr.vmem [resolvable:$true] %s175_s2 }
   0x6   :  { %204 = vset.pattern.permute.xlu0 %v238_v3  ;;  %206 = vset.pattern.permute.xlu1 %v239_v4  ;;  %v24_v7 = vsub.s32 0, %v23_v6  ;;  %v33_v8 = vsub.s32 1, %v23_v6  ;;  %v43_v11 = vsub.s32 2, %v23_v6  ;;  %v53_v13 = vsub.s32 3, %v23_v6  ;;  %s212_s17 = scalar_lea.vmem %s176_s2, 128  ;;  %p217_p1 = scmp.lt.s32.totalorder %s176_s2, %s176_s2 }
   0x7   :  { %28 = vperm.xlu0 %204, %v15_v0   ;;  %48 = vperm.xlu1 %206, %v15_v0   ;;  %p213_p0 = scmp.ne.s32.totalorder %s176_s2, %s212_s17  ;;  %p218_p2 = scmp.lt.s32.totalorder %s212_s17, %s212_s17 }
   0x8   :  { %v25_v14 = vrot.slane %v16_v9, %v24_v7  ;;  %v34_v15 = vrot.slane %v16_v9, %v33_v8  ;;  %v44_v16 = vrot.slane %v16_v9, %v43_v11  ;;  %v54_v17 = vrot.slane %v16_v9, %v53_v13 }
   0x9   :  { %p219_p3 = por %p218_p2, %p217_p1 }
   0xb   :  { %207 = vset.pattern.permute.xlu0 %v239_v4  ;;  %p220_p4 = pnand %p219_p3, %p213_p0 }
  0x81   :  { %v20_v10 = vpop.permute.xlu0 %19  ;;  %v39_v12 = vpop.permute.xlu1 %38 }
  0x82   :  { %v26_v20 = vmul.f32 %v25_v14, %v20_v10  ;;  %v45_v22 = vmul.f32 %v44_v16, %v39_v12 }
  0x86   :  { %v29_v18 = vpop.permute.xlu0 %28  ;;  %v49_v19 = vpop.permute.xlu1 %48 }
  0x87   :  { %v35_v21 = vmul.f32 %v34_v15, %v29_v18  ;;  %v55_v24 = vmul.f32 %v54_v17, %v49_v19 }
  0x89   :  { %v36_v23 = vadd.f32 %v35_v21, %v26_v20 }
  0x8b   :  { %v46_v25 = vadd.f32 %v45_v22, %v36_v23 }
  0x8d   :  { %v56_v27 = vadd.f32 %v55_v24, %v46_v25 }
  0x8f   :  { %v276_v28 = vadd.f32 %v183_v26, %v56_v27 }
  0x91   :  { %v68_v29 = vand.u32 2139095040, %v276_v28  ;;  %v65_v33 = vand.u32 2147483647, %v276_v28  ;;  %vm67_vm7 = vcmp.lt.s32.totalorder %v276_v28, 0  ;;  %vm157_vm12 = vweird.f32 %v276_v28 }
  0x93   :  { %v69_v30 = vshrl.u32 %v68_v29, 23  ;;  %v72_v37 = vand.u32 8388607, %v65_v33  ;;  %vm66_vm8 = vcmp.le.f32.partialorder %v65_v33, 0.7853982 }
  0x95   :  { %v184_v31 = vadd.s32 4294967169, %v69_v30  ;;  %v73_v55 = vor.u32 8388608, %v72_v37 }
  0x97   :  { %v75_v32 = vadd.s32 1, %v184_v31  ;;  %v113_v5 = vshll.u32 %v73_v55, 8 }
  0x99   :  { %vm76_vm0 = vcmp.gt.s32.totalorder %v75_v32, 0 }
  0x9a   :  { %v77_v34 = vsel %vm76_vm0, %v75_v32, 0 }
  0x9b   :  { %v79_v35 = vand.u32 31, %v77_v34  ;;  %v78_v38 = vshrl.u32 %v77_v34, 5 }
  0x9d   :  { %v80_v36 = vsub.s32 32, %v79_v35  ;;  %v82_v40 = vshll.u32 %v240_v39, %v79_v35  ;;  %v85_v42 = vshll.u32 %v241_v41, %v79_v35  ;;  %v88_v46 = vshll.u32 %v242_v44, %v79_v35 }
  0x9e   :  { %v91_v49 = vshll.u32 %v243_v47, %v79_v35  ;;  %v94_v52 = vshll.u32 %v244_v50, %v79_v35  ;;  %vm97_vm1 = vcmp.lt.s32.totalorder %v78_v38, 1  ;;  %vm100_vm2 = vcmp.lt.s32.totalorder %v78_v38, 4 }
  0x9f   :  { %v83_v43 = vshrl.u32 %v241_v41, %v80_v36  ;;  %v86_v45 = vshrl.u32 %v242_v44, %v80_v36  ;;  %v89_v48 = vshrl.u32 %v243_v47, %v80_v36  ;;  %v92_v51 = vshrl.u32 %v244_v50, %v80_v36 }
  0xa0   :  { %v95_v54 = vshrl.u32 %v245_v53, %v80_v36  ;;  %v81_v0 = vshrl.u32 %v240_v39, %v80_v36  ;;  %vm99_vm3 = vcmp.lt.s32.totalorder %v78_v38, 3  ;;  %vm98_vm4 = vcmp.lt.s32.totalorder %v78_v38, 2 }
  0xa1   :  { %v84_v56 = vor.u32 %v83_v43, %v82_v40  ;;  %v87_v57 = vor.u32 %v86_v45, %v85_v42  ;;  %v90_v58 = vor.u32 %v89_v48, %v88_v46  ;;  %v93_v59 = vor.u32 %v92_v51, %v91_v49 }
  0xa2   :  { %v96_v60 = vor.u32 %v95_v54, %v94_v52 }
  0xa3   :  { %v102_v61 = vsel %vm100_vm2, %v90_v58, 2102212464  ;;  %v105_v62 = vsel %vm97_vm1, %v84_v56, %v87_v57  ;;  %v109_v63 = vsel %vm97_vm1, %v87_v57, %v90_v58  ;;  %v106_v1 = vsel %vm100_vm2, %v93_v59, 920167782 }
  0xa4   :  { %v110_v2 = vsel %vm100_vm2, %v96_v60, 1326507024  ;;  %v107_v3 = vsel %vm99_vm3, %v90_v58, %v106_v1  ;;  %v101_v6 = vsel %vm97_vm1, %v81_v0, %v84_v56  ;;  %v103_v7 = vsel %vm99_vm3, %v87_v57, %v102_v61 }
  0xa5   :  { %v111_v4 = vsel %vm99_vm3, %v93_v59, %v110_v2  ;;  %v108_v8 = vsel %vm98_vm4, %v105_v62, %v107_v3  ;;  %v104_v14 = vsel %vm98_vm4, %v101_v6, %v103_v7 }
  0xa6   :  { %v112_v9 = vsel %vm98_vm4, %v109_v63, %v111_v4  ;;  %v285_v12 = vmul.u32.u64.low %v113_v5, %v108_v8  ;;  %v286_v13 = vmul.u32.u64.high %v113_v5, %v108_v8, %v285_v12  ;;  %v120_v16 = vmul.u32 %v113_v5, %v104_v14 }
  0xa7   :  { %v282_v10 = vmul.u32.u64.low %v113_v5, %v112_v9  ;;  %v283_v11 = vmul.u32.u64.high %v113_v5, %v112_v9, %v282_v10 }
  0xa8   :  { %v123_v15 = vadd.s32 1, %v286_v13 }
  0xa9   :  { %vm122_vm5 = vc.u32 %v283_v11, %v285_v12  ;;  %v121_v29 = vadd.s32 %v285_v12, %v283_v11 }
  0xaa   :  { %v124_v17 = vsel %vm122_vm5, %v123_v15, %v286_v13 }
  0xab   :  { %v125_v18 = vadd.s32 %v124_v17, %v120_v16 }
  0xad   :  { %v126_v19 = vadd.s32 536870912, %v125_v18 }
  0xaf   :  { %v127_v20 = vshrl.u32 %v126_v19, 30 }
  0xb1   :  { %v128_v21 = vshll.u32 %v127_v20, 30  ;;  %v151_v44 = vsub.s32 4, %v127_v20 }
  0xb3   :  { %v129_v22 = vsub.s32 %v125_v18, %v128_v21  ;;  %v152_v46 = vsel %vm67_vm7, %v151_v44, %v127_v20 }
  0xb4   :  { %v154_v47 = vsel %vm66_vm8, 0, %v152_v46 }
  0xb5   :  { %v131_v23 = vsub.s32 0, %v129_v22  ;;  %v158_v48 = vand.u32 3, %v154_v47 }
  0xb7   :  { %v185_v24 = vmin.u32 %v131_v23, %v129_v22  ;;  %vm163_vm9 = vcmp.eq.s32.totalorder %v158_v48, 2  ;;  %vm160_vm10 = vcmp.eq.s32.totalorder %v158_v48, 0  ;;  %vm159_vm11 = vcmp.lt.s32.totalorder %v158_v48, 2 }
  0xb9   :  { %v133_v25 = vclz %v185_v24 }
  0xbb   :  { %v186_v26 = vadd.s32 4294967294, %v133_v25 }
  0xbd   :  { %vm187_vm6 = vcmp.lt.s32.totalorder %v186_v26, 0 }
  0xbe   :  { %v136_v27 = vsel %vm187_vm6, 0, %v186_v26 }
  0xbf   :  { %v137_v30 = vsub.s32 32, %v136_v27  ;;  %v141_v31 = vsub.s32 4294967266, %v136_v27  ;;  %v138_v32 = vshll.u32 %v129_v22, %v136_v27 }
  0xc1   :  { %v139_v34 = vshrl.u32 %v121_v29, %v137_v30  ;;  %v142_v35 = vadd.s32 127, %v141_v31 }
  0xc3   :  { %v140_v36 = vor.u32 %v139_v34, %v138_v32  ;;  %v143_v37 = vshll.u32 %v142_v35, 23 }
  0xc5   :  { %v144_v38 = vor.u32 4788187, %v143_v37  ;;  %v147_v40 = vcvt.s32.f32 %v140_v36 }
  0xc7   :  { %v145_v39 = vand.u32 2147483647, %v144_v38 }
  0xc9   :  { %v148_v41 = vmul.f32 %v147_v40, %v145_v39 }
  0xcb   :  { %v149_v42 = vxor.u32 2147483648, %v148_v41 }
  0xcd   :  { %v150_v43 = vsel %vm67_vm7, %v149_v42, %v148_v41 }
  0xce   :  { %v153_v45 = vsel %vm66_vm8, %v276_v28, %v150_v43 }
  0xcf   :  { %208 = vcosq.f32 %v153_v45 }
  0xd0   :  { %210 = vsinq.f32 %v153_v45 }
  0xd9   :  { %v209_v49 = vpop.eup %208 }
  0xda   :  { %v211_v50 = vpop.eup %210  ;;  %v164_v51 = vxor.u32 2147483648, %v209_v49 }
  0xdb   :  { %v161_v52 = vxor.u32 2147483648, %v211_v50 }
  0xdc   :  { %v165_v53 = vsel %vm163_vm9, %v164_v51, %v211_v50 }
  0xdd   :  { %v162_v33 = vsel %vm160_vm10, %v209_v49, %v161_v52 }
  0xde   :  { %v166_v54 = vsel %vm159_vm11, %v162_v33, %v165_v53 }
  0xdf   :  { %v167_v55 = vsel %vm157_vm12, nan, %v166_v54 }
  0xe0   :  { %168 = vst [vmem:[#allocation2] sm:$0xff] %v167_v55 }
  0xe1   :  { %223 = shalt.err (!%p220_p4)
}
  0xe2   :  { %s224_s20 = scalar_lea.hbm %s312_s3, 128 }
  0xe3   :  { %p225_p5 = scmp.ne.s32.totalorder %s312_s3, %s224_s20  ;;  %p228_p6 = scmp.lt.u32.totalorder %s224_s20, %s312_s3 }
  0xe5   :  { %p230_p7 = pnand %p228_p6, %p225_p5 }
  0xe7   :  { %233 = shalt.err (!%p230_p7)
}
  0xe8   :  { %178 = dma.vmem_to_hbm [thread:$0]  %s176_s2, 128, %s312_s3, [#allocation3]  }
  0xe9   :  { %234 = dma.done.wait [#allocation3], 128  }
  0xea   :  { %235 = vsyncadd [#allocation3], 4294967168 }
  0xeb   :  { %182 = vsyncpa [#allocation3], 1 }

</bundles_post_ra>
